<compile_context>
chip_gen: v5e
topology: v5e:2x2
jax: 0.10.0
libtpu: 0.0.40
codegen_flags: <defaults>
</compile_context>

<pallas_src>
import functools

import jax
import jax.numpy as jnp
from jax.experimental import pallas as pl
from jax.experimental.pallas import tpu as pltpu


def _round_up(x: int, m: int) -> int:
    return ((x + m - 1) // m) * m


def _mlp_fused_kernel(x_ref, w_ref, b_ref, o_ref, *, n_layers: int, compute_dtype):
    """Fused MLP forward on one (tm, D) row-tile of the batch.

    x_ref: (tm, D) f32   w_ref: (L, D, D) compute_dtype   b_ref: (L, 1, D) f32
    o_ref: (tm, D) f32
    All feature dims are zero-padded to D (multiple of 128), so padded lanes stay
    exactly zero through every layer (0-weights, 0-bias, ReLU(0)=0).
    """
    h = x_ref[...].astype(compute_dtype)
    for layer in range(n_layers):
        # MXU matmul: bf16 operands, f32 accumulation.
        y = jnp.dot(h, w_ref[layer], preferred_element_type=jnp.float32)
        y = y + b_ref[layer]  # (1, D) f32 bias, broadcast over rows (f32 epilogue)
        if layer < n_layers - 1:
            y = jnp.maximum(y, 0.0)          # ReLU in f32 (v5e VPU has no bf16)
            h = y.astype(compute_dtype)      # feed next MXU pass in bf16
        else:
            o_ref[...] = y.astype(o_ref.dtype)


def init_mlp_params(key, n_input, n_hidden_layers, n_output, h_units):
    """Deterministic parameter init (PyTorch nn.Linear-style uniform bounds).

    Returns a list of (w, b) with w stored (in_features, out_features), b (out_features,).
    """
    if isinstance(h_units, list):
        dims = [n_input] + list(h_units) + [n_output]
    else:
        dims = [n_input] + [h_units] * n_hidden_layers + [n_output]
    params = []
    for fan_in, fan_out in zip(dims[:-1], dims[1:]):
        key, wk, bk = jax.random.split(key, 3)
        bound = 1.0 / jnp.sqrt(fan_in)
        w = jax.random.uniform(wk, (fan_in, fan_out), jnp.float32, -bound, bound)
        b = jax.random.uniform(bk, (fan_out,), jnp.float32, -bound, bound)
        params.append((w, b))
    return params


def pack_mlp_params(params, compute_dtype=jnp.bfloat16):
    """Pack per-layer (w, b) into lane-padded stacked buffers (done once, not per call).

    Every feature dim is zero-padded up to D = multiple of 128, so all layers share a
    single (L, D, D) weight buffer and a single (L, 1, D) bias buffer.
    """
    n_layers = len(params)
    n_input = params[0][0].shape[0]
    n_output = params[-1][0].shape[1]
    all_dims = [n_input] + [w.shape[1] for (w, _) in params]
    D = max(128, _round_up(max(all_dims), 128))

    w_all = jnp.zeros((n_layers, D, D), compute_dtype)
    b_all = jnp.zeros((n_layers, 1, D), jnp.float32)
    for l, (w, b) in enumerate(params):
        fi, fo = w.shape
        w_all = w_all.at[l, :fi, :fo].set(w.astype(compute_dtype))
        b_all = b_all.at[l, 0, :fo].set(b)
    return {"w_all": w_all, "b_all": b_all, "n_input": n_input, "n_output": n_output}


def softmax_regression_mlp_forward(packed, x):
    """Reproduces SoftmaxRegressionMLP.forward: (Linear+ReLU)*hidden, final Linear."""
    w_all, b_all = packed["w_all"], packed["b_all"]
    n_input, n_output = packed["n_input"], packed["n_output"]
    L, D, _ = w_all.shape
    M = x.shape[0]

    # Row tile: batch padded to a multiple of 8 sublanes; large batches tile at 128 rows
    # and the resulting grid axis is "parallel" (v7x 2-TC sharding).
    tm = min(_round_up(max(M, 1), 8), 128)
    M_pad = _round_up(M, tm)

    x_pad = jnp.zeros((M_pad, D), jnp.float32).at[:M, :n_input].set(x)

    out_pad = pl.pallas_call(
        functools.partial(
            _mlp_fused_kernel, n_layers=L, compute_dtype=w_all.dtype
        ),
        out_shape=jax.ShapeDtypeStruct((M_pad, D), jnp.float32),
        grid=(M_pad // tm,),
        in_specs=[
            pl.BlockSpec((tm, D), lambda i: (i, 0)),       # activations row-tile
            pl.BlockSpec((L, D, D), lambda i: (0, 0, 0)),  # all weights, one buffer
            pl.BlockSpec((L, 1, D), lambda i: (0, 0, 0)),  # all biases, one buffer
        ],
        out_specs=pl.BlockSpec((tm, D), lambda i: (i, 0)),
        compiler_params=pltpu.CompilerParams(
            dimension_semantics=("parallel",),
        ),
    )(x_pad, w_all, b_all)

    return out_pad[:M, :n_output]


if __name__ == "__main__":
    # Small config consistent with the module: n_input=32, 2 hidden layers of 32, n_output=10
    n_input, n_hidden_layers, n_output, h_units = 32, 2, 10, 32
    batch = 8

    key = jax.random.PRNGKey(0)
    key, xk = jax.random.split(key)
    x = jax.random.normal(xk, (batch, n_input), jnp.float32)

    params = init_mlp_params(key, n_input, n_hidden_layers, n_output, h_units)
    packed = pack_mlp_params(params, compute_dtype=jnp.bfloat16)

    out = softmax_regression_mlp_forward(packed, x)
    out = jax.block_until_ready(out)

    # Pure-JAX reference with matching numerics (bf16 operands, f32 accumulation/epilogue).
    ref = x
    for idx, (w, b) in enumerate(params):
        ref = jnp.dot(
            ref.astype(jnp.bfloat16),
            w.astype(jnp.bfloat16),
            preferred_element_type=jnp.float32,
        ) + b
        if idx != len(params) - 1:
            ref = jnp.maximum(ref, 0.0)

    assert out.shape == (batch, n_output)
    assert jnp.allclose(out, ref, atol=1e-2, rtol=1e-2)

    print("KERNEL_OK")
</pallas_src>

<mosaic_0001>
module attributes {stable_mosaic.version = 11 : i64} {
  func.func @_mlp_fused_kernel(%arg0: i32, %arg1: memref<8x128xf32, #tpu.memory_space<vmem>>, %arg2: memref<3x128x128xbf16, #tpu.memory_space<vmem>>, %arg3: memref<3x1x128xf32, #tpu.memory_space<vmem>>, %arg4: memref<8x128xf32, #tpu.memory_space<vmem>>) attributes {dimension_semantics = [#tpu.dimension_semantics<parallel>], iteration_bounds = array<i64: 1>, scalar_prefetch = 0 : i64, scratch_operands = 0 : i64, tpu.core_type = #tpu.core_type<tc>, window_params = [{transform_indices = @transform_0, window_bounds = array<i64: 8, 128>}, {pipeline_mode = #tpu.pipeline_mode<synchronous>, transform_indices = @transform_1, window_bounds = array<i64: 3, 128, 128>}, {pipeline_mode = #tpu.pipeline_mode<synchronous>, transform_indices = @transform_2, window_bounds = array<i64: 3, 1, 128>}, {transform_indices = @transform_3, window_bounds = array<i64: 8, 128>}]} {
    %c0 = arith.constant 0 : index
    %c0_0 = arith.constant 0 : index
    %0 = vector.load %arg1[%c0, %c0_0] : memref<8x128xf32, #tpu.memory_space<vmem>>, vector<8x128xf32>
    %1 = arith.truncf %0 : vector<8x128xf32> to vector<8x128xbf16>
    %c0_1 = arith.constant 0 : index
    %c0_2 = arith.constant 0 : index
    %c0_3 = arith.constant 0 : index
    %2 = vector.load %arg2[%c0_1, %c0_2, %c0_3] : memref<3x128x128xbf16, #tpu.memory_space<vmem>>, vector<1x128x128xbf16>
    %3 = vector.shape_cast %2 : vector<1x128x128xbf16> to vector<128x128xbf16>
    %cst = arith.constant dense<0.000000e+00> : vector<8x128xf32>
    %4 = tpu.matmul %1, %3, %cst {dimension_numbers = #tpu.dot_dimension_numbers<[1], [0], [0], [1], [0, 0, 1, 1], [], []>} : vector<8x128xbf16>, vector<128x128xbf16>, vector<8x128xf32> -> vector<8x128xf32>
    %c0_4 = arith.constant 0 : index
    %c0_5 = arith.constant 0 : index
    %c0_6 = arith.constant 0 : index
    %5 = vector.load %arg3[%c0_4, %c0_5, %c0_6] : memref<3x1x128xf32, #tpu.memory_space<vmem>>, vector<1x1x128xf32>
    %6 = vector.shape_cast %5 : vector<1x1x128xf32> to vector<1x128xf32>
    %7 = vector.broadcast %6 : vector<1x128xf32> to vector<8x128xf32>
    %8 = arith.addf %4, %7 : vector<8x128xf32>
    %cst_7 = arith.constant 0.000000e+00 : f32
    %9 = vector.broadcast %cst_7 : f32 to vector<8x128xf32>
    %10 = arith.maximumf %8, %9 : vector<8x128xf32>
    %11 = arith.truncf %10 : vector<8x128xf32> to vector<8x128xbf16>
    %c1 = arith.constant 1 : index
    %c0_8 = arith.constant 0 : index
    %c0_9 = arith.constant 0 : index
    %12 = vector.load %arg2[%c1, %c0_8, %c0_9] : memref<3x128x128xbf16, #tpu.memory_space<vmem>>, vector<1x128x128xbf16>
    %13 = vector.shape_cast %12 : vector<1x128x128xbf16> to vector<128x128xbf16>
    %cst_10 = arith.constant dense<0.000000e+00> : vector<8x128xf32>
    %14 = tpu.matmul %11, %13, %cst_10 {dimension_numbers = #tpu.dot_dimension_numbers<[1], [0], [0], [1], [0, 0, 1, 1], [], []>} : vector<8x128xbf16>, vector<128x128xbf16>, vector<8x128xf32> -> vector<8x128xf32>
    %c1_11 = arith.constant 1 : index
    %c0_12 = arith.constant 0 : index
    %c0_13 = arith.constant 0 : index
    %15 = vector.load %arg3[%c1_11, %c0_12, %c0_13] : memref<3x1x128xf32, #tpu.memory_space<vmem>>, vector<1x1x128xf32>
    %16 = vector.shape_cast %15 : vector<1x1x128xf32> to vector<1x128xf32>
    %17 = vector.broadcast %16 : vector<1x128xf32> to vector<8x128xf32>
    %18 = arith.addf %14, %17 : vector<8x128xf32>
    %cst_14 = arith.constant 0.000000e+00 : f32
    %19 = vector.broadcast %cst_14 : f32 to vector<8x128xf32>
    %20 = arith.maximumf %18, %19 : vector<8x128xf32>
    %21 = arith.truncf %20 : vector<8x128xf32> to vector<8x128xbf16>
    %c2 = arith.constant 2 : index
    %c0_15 = arith.constant 0 : index
    %c0_16 = arith.constant 0 : index
    %22 = vector.load %arg2[%c2, %c0_15, %c0_16] : memref<3x128x128xbf16, #tpu.memory_space<vmem>>, vector<1x128x128xbf16>
    %23 = vector.shape_cast %22 : vector<1x128x128xbf16> to vector<128x128xbf16>
    %cst_17 = arith.constant dense<0.000000e+00> : vector<8x128xf32>
    %24 = tpu.matmul %21, %23, %cst_17 {dimension_numbers = #tpu.dot_dimension_numbers<[1], [0], [0], [1], [0, 0, 1, 1], [], []>} : vector<8x128xbf16>, vector<128x128xbf16>, vector<8x128xf32> -> vector<8x128xf32>
    %c2_18 = arith.constant 2 : index
    %c0_19 = arith.constant 0 : index
    %c0_20 = arith.constant 0 : index
    %25 = vector.load %arg3[%c2_18, %c0_19, %c0_20] : memref<3x1x128xf32, #tpu.memory_space<vmem>>, vector<1x1x128xf32>
    %26 = vector.shape_cast %25 : vector<1x1x128xf32> to vector<1x128xf32>
    %27 = vector.broadcast %26 : vector<1x128xf32> to vector<8x128xf32>
    %28 = arith.addf %24, %27 : vector<8x128xf32>
    %c0_21 = arith.constant 0 : index
    %c0_22 = arith.constant 0 : index
    %29 = vector.load %arg4[%c0_21, %c0_22] : memref<8x128xf32, #tpu.memory_space<vmem>>, vector<8x128xf32>
    tpu.vector_store %arg4[%c0_21, %c0_22], %28 {strides = array<i32>} : memref<8x128xf32, #tpu.memory_space<vmem>>, vector<8x128xf32>,
    return
  }
  func.func @transform_0(%arg0: i32) -> (i32, i32) {
    %c0_i32 = arith.constant 0 : i32
    %c0_i32_0 = arith.constant 0 : i32
    return %arg0, %c0_i32 : i32, i32
  }
  func.func @transform_1(%arg0: i32) -> (i32, i32, i32) {
    %c0_i32 = arith.constant 0 : i32
    %c0_i32_0 = arith.constant 0 : i32
    %c0_i32_1 = arith.constant 0 : i32
    %c0_i32_2 = arith.constant 0 : i32
    return %c0_i32, %c0_i32_0, %c0_i32_1 : i32, i32, i32
  }
  func.func @transform_2(%arg0: i32) -> (i32, i32, i32) {
    %c0_i32 = arith.constant 0 : i32
    %c0_i32_0 = arith.constant 0 : i32
    %c0_i32_1 = arith.constant 0 : i32
    %c0_i32_2 = arith.constant 0 : i32
    return %c0_i32, %c0_i32_0, %c0_i32_1 : i32, i32, i32
  }
  func.func @transform_3(%arg0: i32) -> (i32, i32) {
    %c0_i32 = arith.constant 0 : i32
    %c0_i32_0 = arith.constant 0 : i32
    return %arg0, %c0_i32 : i32, i32
  }
}

</mosaic_0001>

<bundles_post_ra>
// kernel: tpu_custom_call.1
= control target key start
LH: loop header
LB: loop body
LE: loop exit
PB: predicated region body
PF: predicated region fallthrough
CT: control target
= control target key end

     0   :  { %8 = vsyncpa [#allocation3], 0  ;;  %s605_s0 = inlined_call_operand.hbm [shape: f32[8,128], index: 0, kind: input, shape index: {}]   ;;  %s606_s1 = inlined_call_operand.hbm [shape: bf16[3,128,128], index: 1, kind: input, shape index: {}]   ;;  %s607_s2 = inlined_call_operand.hbm [shape: f32[3,1,128], index: 2, kind: input, shape index: {}]   ;;  %s608_s3 = inlined_call_operand.hbm [shape: f32[8,128], index: 3, kind: output, shape index: {}]  }
   0x1   :  { %9 = vsyncpa [#allocation6], 0  ;;  %s26_s14 = sshll.u32 %s606_s1, 4  ;;  %s27_s14 = int_to_ptr.hbm [resolvable:$true] %s26_s14 }
   0x2   :  { %10 = vsyncpa [#allocation4], 0  ;;  %s565_s15 = smov [#allocation5]   ;;  %s16_s19 = sshll.u32 %s605_s0, 4  ;;  %s17_s19 = int_to_ptr.hbm [resolvable:$true] %s16_s19 }
   0x3   :  { %s28_s16 = sshll.u32 %s565_s15, 4  ;;  %s566_s20 = smov 64   ;;  %s29_s16 = int_to_ptr.vmem [resolvable:$true] %s28_s16 }
   0x4   :  { %s567_s21 = smov 4   ;;  %s568_s22 = smov [#allocation2]  }
   0x5   :  { %34 = dma.hbm_to_vmem [thread:$0]  %s27_s14, 3072, %s29_s16, [#allocation6], %s566_s20, %s566_s20, %s567_s21  }
   0x6   :  { %s18_s23 = sshll.u32 %s568_s22, 4  ;;  %s39_s26 = sshll.u32 %s607_s2, 4  ;;  %s19_s23 = int_to_ptr.vmem [resolvable:$true] %s18_s23  ;;  %s40_s26 = int_to_ptr.hbm [resolvable:$true] %s39_s26 }
   0x7   :  { %21 = dma.hbm_to_vmem [thread:$0]  %s17_s19, 128, %s19_s23, [#allocation3]  }
   0x8   :  { %s569_s1 = smov [#allocation7]   ;;  %s570_s28 = smov 16  }
   0x9   :  { %s41_s27 = sshll.u32 %s569_s1, 4  ;;  %s571_s29 = smov 1   ;;  %s42_s27 = int_to_ptr.vmem [resolvable:$true] %s41_s27 }
   0xa   :  { %47 = dma.hbm_to_vmem [thread:$0]  %s40_s26, 48, %s42_s27, [#allocation6], %s570_s28, %s570_s28, %s571_s29  }
   0xb   :  { %559 = dma.done.wait [#allocation3], 128  }
   0xc   :  { %560 = vsyncadd [#allocation3], 4294967168 }
   0xd   :  { %561 = dma.done.wait [#allocation6], 3120  }
   0xe   :  { %562 = vsyncadd [#allocation6], 4294964176  ;;  %v435_v0 = vld [vmem:[#allocation5 + $0x38] sm:$0xff]  ;;  %v434_v1 = vld [vmem:[#allocation5 + $0x30] sm:$0xff]  ;;  %s572_s0 = smov [#allocation8]   ;;  %s321_s5 = sshll.u32 %s608_s3, 4  ;;  %s322_s5 = int_to_ptr.hbm [resolvable:$true] %s321_s5 }
   0xf   :  { %130 = vmatpush.bf16.msra.mxu0 %v435_v0  ;;  %v443_v2 = vld [vmem:[#allocation5 + $0x78] sm:$0xff]  ;;  %v442_v3 = vld [vmem:[#allocation5 + $0x70] sm:$0xff]  ;;  %v433_v4 = vld [vmem:[#allocation5 + $0x28] sm:$0xff]  ;;  %s319_s2 = sshll.u32 %s572_s0, 4  ;;  %s320_s2 = int_to_ptr.vmem [resolvable:$true] %s319_s2 }
  0x10   :  { %215 = vmatpush.bf16.msra.mxu1 %v443_v2  ;;  %v441_v5 = vld [vmem:[#allocation5 + $0x68] sm:$0xff]  ;;  %v432_v6 = vld [vmem:[#allocation5 + $0x20] sm:$0xff]  ;;  %v431_v8 = vld [vmem:[#allocation5 + $0x18] sm:$0xff] }
  0x11   :  { %v440_v7 = vld [vmem:[#allocation5 + $0x60] sm:$0xff]  ;;  %v439_v9 = vld [vmem:[#allocation5 + $0x58] sm:$0xff]  ;;  %v430_v10 = vld [vmem:[#allocation5 + $0x10] sm:$0xff] }
  0x12   :  { %v438_v11 = vld [vmem:[#allocation5 + $0x50] sm:$0xff]  ;;  %v429_v12 = vld [vmem:[#allocation5 + $0x8] sm:$0xff]  ;;  %v428_v13 = vld [vmem:[#allocation5] sm:$0xff] }
  0x13   :  { %131 = vmatpush.bf16.msra.mxu0 %v434_v1  ;;  %v60_v14 = vld [vmem:[#allocation2] sm:$0xff]  ;;  %v437_v16 = vld [vmem:[#allocation5 + $0x48] sm:$0xff]  ;;  %v436_v17 = vld [vmem:[#allocation5 + $0x40] sm:$0xff] }
  0x14   :  { %216 = vmatpush.bf16.msra.mxu1 %v442_v3  ;;  %v61_v15 = vpack.c.bf16 %v60_v14, %v60_v14  ;;  %v451_v18 = vld [vmem:[#allocation5 + $0xb8] sm:$0xff]  ;;  %v450_v19 = vld [vmem:[#allocation5 + $0xb0] sm:$0xff]  ;;  %v449_v20 = vld [vmem:[#allocation5 + $0xa8] sm:$0xff] }
  0x15   :  { %300 = vmatpush.bf16.msra.mxu2 %v451_v18  ;;  %v448_v21 = vld [vmem:[#allocation5 + $0xa0] sm:$0xff]  ;;  %v447_v22 = vld [vmem:[#allocation5 + $0x98] sm:$0xff]  ;;  %v446_v23 = vld [vmem:[#allocation5 + $0x90] sm:$0xff] }
  0x16   :  { %v460_v24 = vld [vmem:[#allocation7] ss:$0 sm:$0xff]  ;;  %v445_v30 = vld [vmem:[#allocation5 + $0x88] sm:$0xff]  ;;  %v461_v32 = vld [vmem:[#allocation7 + $0x1] ss:$0 sm:$0xff] }
  0x17   :  { %132 = vmatpush.bf16.msra.mxu0 %v433_v4  ;;  %v444_v31 = vld [vmem:[#allocation5 + $0x80] sm:$0xff] }
  0x18   :  { %217 = vmatpush.bf16.msra.mxu1 %v441_v5  ;;  %v462_v38 = vld [vmem:[#allocation7 + $0x2] ss:$0 sm:$0xff] }
  0x19   :  { %301 = vmatpush.bf16.msra.mxu2 %v450_v19 }
  0x1b   :  { %133 = vmatpush.bf16.msra.mxu0 %v432_v6 }
  0x1c   :  { %218 = vmatpush.bf16.msra.mxu1 %v440_v7 }
  0x1d   :  { %302 = vmatpush.bf16.msra.mxu2 %v449_v20 }
  0x1f   :  { %134 = vmatpush.bf16.msra.mxu0 %v431_v8 }
  0x20   :  { %219 = vmatpush.bf16.msra.mxu1 %v439_v9 }
  0x21   :  { %303 = vmatpush.bf16.msra.mxu2 %v448_v21 }
  0x23   :  { %135 = vmatpush.bf16.msra.mxu0 %v430_v10 }
  0x24   :  { %220 = vmatpush.bf16.msra.mxu1 %v438_v11 }
  0x25   :  { %304 = vmatpush.bf16.msra.mxu2 %v447_v22 }
  0x27   :  { %136 = vmatpush.bf16.msra.mxu0 %v429_v12 }
  0x28   :  { %221 = vmatpush.bf16.msra.mxu1 %v437_v16 }
  0x29   :  { %305 = vmatpush.bf16.msra.mxu2 %v446_v23 }
  0x2b   :  { %137 = vmatpush.bf16.msra.mxu0 %v428_v13 }
  0x2c   :  { %222 = vmatpush.bf16.msra.mxu1 %v436_v17 }
  0x2d   :  { %306 = vmatpush.bf16.msra.mxu2 %v445_v30 }
  0x2e   :  { %138 = vmatmul.bf16.vlgmr.msra.gmra.mxu0 %v61_v15 }
  0x31   :  { %307 = vmatpush.bf16.msra.mxu2 %v444_v31 }
  0xab   :  { %v139_v25 = vpop.f32.mrf.mxu0 }
  0xac   :  { %v140_v26 = vadd.f32 %v460_v24, %v139_v25 }
  0xae   :  { %v143_v27 = vmax.f32 %v140_v26, 0.0 }
  0xb0   :  { %v144_v28 = vpack.c.bf16 %v143_v27, %v143_v27 }
  0xb2   :  { %223 = vmatmul.bf16.vlgmr.msra.gmra.mxu1 %v144_v28 }
  0xb3   :  { %v141_v29 = vpop.f32.mrf.mxu0 }
 0x12f   :  { %v224_v33 = vpop.f32.mrf.mxu1 }
 0x130   :  { %v225_v34 = vadd.f32 %v461_v32, %v224_v33 }
 0x132   :  { %v228_v35 = vmax.f32 %v225_v34, 0.0 }
 0x134   :  { %v229_v36 = vpack.c.bf16 %v228_v35, %v228_v35 }
 0x136   :  { %308 = vmatmul.bf16.vlgmr.msra.gmra.mxu2 %v229_v36 }
 0x137   :  { %v226_v37 = vpop.f32.mrf.mxu1 }
 0x1b9   :  { %v309_v39 = vpop.f32.mrf.mxu2 }
 0x1ba   :  { %v310_v40 = vadd.f32 %v462_v38, %v309_v39 }
 0x1bc   :  { %313 = vst [vmem:[#allocation8] sm:$0xff] %v310_v40 }
 0x1bd   :  { %324 = dma.vmem_to_hbm [thread:$0]  %s320_s2, 128, %s322_s5, [#allocation4]  }
 0x1c1   :  { %v311_v41 = vpop.f32.mrf.mxu2 }
 0x1c2   :  { %563 = dma.done.wait [#allocation4], 128  }
 0x1c3   :  { %564 = vsyncadd [#allocation4], 4294967168 }
 0x1c4   :  { %329 = vsyncpa [#allocation3], 1 }
 0x1c5   :  { %330 = vsyncpa [#allocation6], 1 }
 0x1c6   :  { %331 = vsyncpa [#allocation4], 1 }

</bundles_post_ra>
